<compile_context>
chip_gen: v7x
topology: tpu7x:2x2x1
jax: 0.10.0
libtpu: 0.0.40
codegen_flags: <defaults>
</compile_context>

<pallas_src>
import functools
import math

import jax
import jax.numpy as jnp
from jax.experimental import pallas as pl
from jax.experimental.pallas import tpu as pltpu

_LANE = 128
_SUB = 8


def _fake_quant_kernel(x_ref, o_ref, *, inv_scale, scale, quant_min, quant_max):
    """Elementwise fake-quantize of one VMEM tile; all scalars are immediates."""
    x = x_ref[...].astype(jnp.float32)
    # NOTE: jnp.round is round-half-to-even (same as torch.round); if the nndct
    # derivative uses a half-up DPU round mode, swap in jnp.floor(x*inv+0.5).
    q = jnp.clip(jnp.round(x * inv_scale), quant_min, quant_max)
    o_ref[...] = (q * scale).astype(o_ref.dtype)


def _fake_quant_jax(x, bitwidth, scale):
    """Single fused pure-JAX pass (used as reference and as the ragged path)."""
    domain = 2.0 ** (bitwidth - 1)
    xf = x.astype(jnp.float32)
    q = jnp.clip(jnp.round(xf / scale), -domain, domain - 1.0)
    return (q * scale).astype(x.dtype)


def _generation_params():
    """Return (target_block_bytes, vmem_limit_bytes) for the local TPU chip."""
    try:
        kind = jax.devices()[0].device_kind.lower()
    except Exception:
        kind = ""
    if "v7" in kind or "7x" in kind:
        # 8 MiB blocks -> in+out double-buffered ~32 MiB; raise scoped VMEM
        # (64 MiB physical / 32 MiB default on v7x).
        return 8 * 1024 * 1024, 48 << 20
    if "v6" in kind:
        # 4 MiB blocks -> 16 MiB double-buffered usage, fits the 32 MiB default.
        return 4 * 1024 * 1024, 32 << 20
    # v5e has a 16 MiB scoped-VMEM default; stay conservative there (and for
    # unknown chips). Per-step overhead is already <7% at 0.82 TB/s.
    return 2 * 1024 * 1024, None


def fake_quantize(x, bitwidth=8, scale=1.0 / 32.0, quant_enabled=True,
                  donate_input=False):
    """JAX wrapper reproducing FakeQuantizer forward semantics for any shape."""
    if not quant_enabled:
        # quant_enabled buffer == 0 -> identity pass-through; skip the kernel
        # and both full HBM round-trips entirely.
        return x

    # nndct uses power-of-2 scaling, so multiplying by 1/scale is exact.
    assert math.frexp(float(scale))[0] == 0.5, (
        "FakeQuantizer assumes a power-of-2 scale")

    orig_shape = x.shape
    orig_dtype = x.dtype
    flat = x.reshape(-1)
    n = flat.shape[0]

    if n == 0:
        return x
    if n % _LANE != 0:
        # Ragged tail: one fused XLA elementwise pass (1 read + 1 write) is
        # strictly cheaper than pad + kernel + slice (~3x traffic).
        return _fake_quant_jax(x, bitwidth, scale)

    # Widest lane-dense width dividing n (reshape is then a free bitcast).
    width = _LANE
    for w in (4096, 2048, 1024, 512, 256, 128):
        if n % w == 0:
            width = w
            break
    x2d = flat.reshape(-1, width)
    rows = x2d.shape[0]

    itemsize = jnp.dtype(orig_dtype).itemsize
    # Sublane packing: 8 rows for 32-bit, 16 for 16-bit, 32 for 8-bit dtypes.
    sub_mult = _SUB * max(1, 4 // itemsize)

    block_bytes, vmem_limit = _generation_params()
    target_rows = max(sub_mult,
                      (block_bytes // (width * itemsize)) // sub_mult * sub_mult)

    if rows <= target_rows:
        if rows >= 2 * sub_mult:
            # Split a would-be single block into >=2 grid steps so that
            # ("parallel",) can shard them across both v7x TensorCores.
            half = (rows + 1) // 2
            block_rows = ((half + sub_mult - 1) // sub_mult) * sub_mult
        else:
            block_rows = rows  # full row extent -> always a legal block
    else:
        # Prefer a divisor of rows near the target so every step streams a
        # full, unmasked tile; otherwise accept one masked partial last block.
        block_rows = target_rows
        lower = max(target_rows // 2, sub_mult)
        for br in range(target_rows, lower - 1, -sub_mult):
            if rows % br == 0:
                block_rows = br
                break
    grid = (pl.cdiv(rows, block_rows),)

    domain = 2.0 ** (bitwidth - 1)
    kernel = functools.partial(
        _fake_quant_kernel,
        inv_scale=float(1.0 / scale),
        scale=float(scale),
        quant_min=float(-domain),
        quant_max=float(domain - 1.0),
    )

    out2d = pl.pallas_call(
        kernel,
        out_shape=jax.ShapeDtypeStruct((rows, width), orig_dtype),
        grid=grid,
        in_specs=[pl.BlockSpec((block_rows, width), lambda i: (i, 0))],
        out_specs=pl.BlockSpec((block_rows, width), lambda i: (i, 0)),
        input_output_aliases={0: 0} if donate_input else {},
        compiler_params=pltpu.CompilerParams(
            dimension_semantics=("parallel",),
            vmem_limit_bytes=vmem_limit),
    )(x2d)

    return out2d.reshape(orig_shape)


if __name__ == "__main__":
    key = jax.random.PRNGKey(0)
    bitwidth = 8
    scale = 1.0 / 32.0  # power-of-2 scale (fragpos = 5)

    # Small NCHW activation, consistent with a conv-style input to the quantizer.
    x = jax.random.normal(key, (2, 4, 16, 16), dtype=jnp.float32)
    out = jax.block_until_ready(
        fake_quantize(x, bitwidth=bitwidth, scale=scale, quant_enabled=True))
    ref = _fake_quant_jax(x, bitwidth, scale)
    assert out.shape == x.shape and out.dtype == x.dtype
    assert jnp.max(jnp.abs(out - ref)) < 1e-6

    # quant_enabled == 0 -> identity pass-through.
    out_bypass = jax.block_until_ready(
        fake_quantize(x, bitwidth=bitwidth, scale=scale, quant_enabled=False))
    assert jnp.max(jnp.abs(out_bypass - x)) == 0.0

    # bf16 input: dtype preserved, cast happens inside the kernel,
    # dtype-aware (16-row) block granularity is exercised.
    x_bf16 = jax.random.normal(jax.random.PRNGKey(1), (2, 4, 16, 16),
                               dtype=jnp.bfloat16)
    out_bf16 = jax.block_until_ready(
        fake_quantize(x_bf16, bitwidth=bitwidth, scale=scale, quant_enabled=True))
    ref_bf16 = _fake_quant_jax(x_bf16, bitwidth, scale)
    assert out_bf16.dtype == jnp.bfloat16
    assert jnp.max(jnp.abs(out_bf16.astype(jnp.float32) -
                           ref_bf16.astype(jnp.float32))) == 0.0

    # Multi-row tensor -> exercises the >=2-block (megacore-friendly) grid path.
    x_big = jax.random.normal(jax.random.PRNGKey(3), (2, 8, 64, 64),
                              dtype=jnp.float32)
    out_big = jax.block_until_ready(
        fake_quantize(x_big, bitwidth=bitwidth, scale=scale, quant_enabled=True))
    ref_big = _fake_quant_jax(x_big, bitwidth, scale)
    assert jnp.max(jnp.abs(out_big - ref_big)) < 1e-6

    # Ragged element count (not a multiple of 128) -> fused single-pass path.
    x_rag = jax.random.normal(jax.random.PRNGKey(2), (3, 5, 7), dtype=jnp.float32)
    out_rag = jax.block_until_ready(
        fake_quantize(x_rag, bitwidth=bitwidth, scale=scale, quant_enabled=True))
    ref_rag = _fake_quant_jax(x_rag, bitwidth, scale)
    assert out_rag.shape == x_rag.shape
    assert jnp.max(jnp.abs(out_rag - ref_rag)) < 1e-6

    print("KERNEL_OK")
</pallas_src>

<mosaic_0001>
module attributes {stable_mosaic.version = 11 : i64} {
  func.func @_fake_quant_kernel(%arg0: i32, %arg1: memref<1x2048xf32, #tpu.memory_space<vmem>>, %arg2: memref<1x2048xf32, #tpu.memory_space<vmem>>) attributes {dimension_semantics = [#tpu.dimension_semantics<parallel>], iteration_bounds = array<i64: 1>, scalar_prefetch = 0 : i64, scratch_operands = 0 : i64, tpu.core_type = #tpu.core_type<tc>, window_params = [{transform_indices = @transform_0, window_bounds = array<i64: 1, 2048>}, {transform_indices = @transform_1, window_bounds = array<i64: 1, 2048>}]} {
    %c0 = arith.constant 0 : index
    %c0_0 = arith.constant 0 : index
    %0 = vector.load %arg1[%c0, %c0_0] : memref<1x2048xf32, #tpu.memory_space<vmem>>, vector<1x2048xf32>
    %cst = arith.constant 3.200000e+01 : f32
    %1 = vector.broadcast %cst : f32 to vector<1x2048xf32>
    %2 = arith.mulf %0, %1 : vector<1x2048xf32>
    %3 = math.roundeven %2 : vector<1x2048xf32>
    %cst_1 = arith.constant -1.280000e+02 : f32
    %cst_2 = arith.constant 1.270000e+02 : f32
    %4 = vector.broadcast %cst_1 : f32 to vector<1x2048xf32>
    %5 = arith.maximumf %4, %3 : vector<1x2048xf32>
    %6 = vector.broadcast %cst_2 : f32 to vector<1x2048xf32>
    %7 = arith.minimumf %6, %5 : vector<1x2048xf32>
    %cst_3 = arith.constant 3.125000e-02 : f32
    %8 = vector.broadcast %cst_3 : f32 to vector<1x2048xf32>
    %9 = arith.mulf %7, %8 : vector<1x2048xf32>
    %c0_4 = arith.constant 0 : index
    %c0_5 = arith.constant 0 : index
    %10 = vector.load %arg2[%c0_4, %c0_5] : memref<1x2048xf32, #tpu.memory_space<vmem>>, vector<1x2048xf32>
    tpu.vector_store %arg2[%c0_4, %c0_5], %9 {strides = array<i32>} : memref<1x2048xf32, #tpu.memory_space<vmem>>, vector<1x2048xf32>,
    return
  }
  func.func @transform_0(%arg0: i32) -> (i32, i32) {
    %c0_i32 = arith.constant 0 : i32
    %c0_i32_0 = arith.constant 0 : i32
    return %arg0, %c0_i32 : i32, i32
  }
  func.func @transform_1(%arg0: i32) -> (i32, i32) {
    %c0_i32 = arith.constant 0 : i32
    %c0_i32_0 = arith.constant 0 : i32
    return %arg0, %c0_i32 : i32, i32
  }
}

</mosaic_0001>

<bundles_post_ra>
// kernel: tpu_custom_call.1
= control target key start
LH: loop header
LB: loop body
LE: loop exit
PB: predicated region body
PF: predicated region fallthrough
CT: control target
= control target key end

     0   :  { %6 = vsyncpa [#allocation3], 0  ;;  %s138_s0 = inlined_call_operand.hbm [shape: f32[1,2048], index: 0, kind: input, shape index: {}]   ;;  %s139_s1 = inlined_call_operand.hbm [shape: f32[1,2048], index: 1, kind: output, shape index: {}]  }
   0x1   :  { %7 = vsyncpa [#allocation4], 0  ;;  %s102_s6 = smov [#allocation2]   ;;  %s54_s10 = scalar_lea.hbm %s138_s0, 256 }
   0x2   :  { %s14_s7 = sshll.u32 %s102_s6, 4  ;;  %p55_p0 = scmp.ne.s32.totalorder %s138_s0, %s54_s10  ;;  %s15_s7 = int_to_ptr.vmem [resolvable:$true] %s14_s7 }
   0x3   :  { %p58_p1 = scmp.lt.u32.totalorder %s54_s10, %s138_s0 }
   0x5   :  { %p60_p2 = pnand %p58_p1, %p55_p0 }
   0x7   :  { %63 = shalt.err (!%p60_p2)
}
   0x8   :  { %s64_s15 = scalar_lea.vmem %s15_s7, 256  ;;  %p69_p4 = scmp.lt.s32.totalorder %s15_s7, %s15_s7 }
   0x9   :  { %p65_p3 = scmp.ne.s32.totalorder %s15_s7, %s64_s15  ;;  %p70_p5 = scmp.lt.s32.totalorder %s64_s15, %s64_s15 }
   0xb   :  { %p71_p6 = por %p70_p5, %p69_p4 }
   0xd   :  { %p72_p7 = pnand %p71_p6, %p65_p3 }
   0xf   :  { %75 = shalt.err (!%p72_p7)
}
  0x10   :  { %17 = dma.hbm_to_vmem [thread:$0]  %s138_s0, 256, %s15_s7, [#allocation3]  }
  0x11   :  { %98 = dma.done.wait [#allocation3], 256  }
  0x12   :  { %99 = vsyncadd [#allocation3], 4294967040  ;;  %v21_v0 = vld [vmem:[#allocation2] sm:$0xff]  ;;  %v22_v1 = vld [vmem:[#allocation2 + $0x8] sm:$0xff]  ;;  %s103_s18 = smov [#allocation5]  }
  0x13   :  { %v23_v2 = vmul.f32 32.0, %v21_v0  ;;  %v24_v3 = vmul.f32 32.0, %v22_v1  ;;  %s41_s19 = sshll.u32 %s103_s18, 4  ;;  %s42_s19 = int_to_ptr.vmem [resolvable:$true] %s41_s19 }
  0x14   :  { %s76_s0 = scalar_lea.vmem %s42_s19, 256  ;;  %p81_p9 = scmp.lt.s32.totalorder %s42_s19, %s42_s19 }
  0x15   :  { %v50_v4 = vround.rtne.f32 %v23_v2  ;;  %v51_v5 = vround.rtne.f32 %v24_v3  ;;  %p77_p8 = scmp.ne.s32.totalorder %s42_s19, %s76_s0  ;;  %p82_p10 = scmp.lt.s32.totalorder %s76_s0, %s76_s0 }
  0x17   :  { %v27_v6 = vmax.f32 %v50_v4, -128.0  ;;  %v28_v7 = vmax.f32 %v51_v5, -128.0  ;;  %p83_p11 = por %p82_p10, %p81_p9 }
  0x19   :  { %v29_v8 = vmin.f32 %v27_v6, 127.0  ;;  %v30_v9 = vmin.f32 %v28_v7, 127.0  ;;  %p84_p12 = pnand %p83_p11, %p77_p8 }
  0x1b   :  { %v31_v10 = vmul.f32 0.03125, %v29_v8  ;;  %v32_v11 = vmul.f32 0.03125, %v30_v9 }
  0x1d   :  { %33 = vst [vmem:[#allocation5] sm:$0xff] %v31_v10  ;;  %34 = vst [vmem:[#allocation5 + $0x8] sm:$0xff] %v32_v11 }
  0x1e   :  { %87 = shalt.err (!%p84_p12)
}
  0x1f   :  { %s88_s22 = scalar_lea.hbm %s139_s1, 256 }
  0x20   :  { %p89_p13 = scmp.ne.s32.totalorder %s139_s1, %s88_s22  ;;  %p92_p0 = scmp.lt.u32.totalorder %s88_s22, %s139_s1 }
  0x22   :  { %p94_p1 = pnand %p92_p0, %p89_p13 }
  0x24   :  { %97 = shalt.err (!%p94_p1)
}
  0x25   :  { %44 = dma.vmem_to_hbm [thread:$0]  %s42_s19, 256, %s139_s1, [#allocation4]  }
  0x26   :  { %100 = dma.done.wait [#allocation4], 256  }
  0x27   :  { %101 = vsyncadd [#allocation4], 4294967040 }
  0x28   :  { %48 = vsyncpa [#allocation3], 1 }
  0x29   :  { %49 = vsyncpa [#allocation4], 1 }

</bundles_post_ra>
